<compile_context>
chip_gen: v6e
topology: v6e:2x2x1
jax: 0.10.0
libtpu: 0.0.40
codegen_flags: <defaults>
</compile_context>

<pallas_src>
import functools

import jax
import jax.numpy as jnp
from jax.experimental import pallas as pl
from jax.experimental.pallas import tpu as pltpu


# ----------------------------------------------------------------------------
# Kernel
# ----------------------------------------------------------------------------
def decoder_kernel(x_ref, w1_ref, b1_ref, w2_ref, b2_ref, w3_ref, b3_ref,
                   out_ref):
    """Whole forward pass for one batch tile; all operands resident in VMEM.

    x arrives f32 (no wrapper-side cast); it is cast to bf16 in-register for
    the MXU.  Accumulation and all post-matmul math stay in f32.
    """
    x = x_ref[...].astype(jnp.bfloat16)                        # (tb, z) bf16

    # fc1 + ReLU
    h1 = jnp.dot(x, w1_ref[...], preferred_element_type=jnp.float32)
    h1 = jnp.maximum(h1 + b1_ref[...], 0.0)                    # f32, lane-dense

    # fc2 + ReLU
    h2 = jnp.dot(h1.astype(jnp.bfloat16), w2_ref[...],
                 preferred_element_type=jnp.float32)
    h2 = jnp.maximum(h2 + b2_ref[...], 0.0)

    # fc3 + Sigmoid
    h3 = jnp.dot(h2.astype(jnp.bfloat16), w3_ref[...],
                 preferred_element_type=jnp.float32)
    h3 = h3 + b3_ref[...]
    out_ref[...] = jax.nn.sigmoid(h3).astype(out_ref.dtype)


# ----------------------------------------------------------------------------
# Host-side helpers
# ----------------------------------------------------------------------------
def _round_up(n, m):
    return ((n + m - 1) // m) * m


def _cdiv(a, b):
    return -(-a // b)


def _pick_block_b(B):
    """Batch tile size.

    * B <= 1024: one tile, grid=(1,) — per-step pipeline overhead (~0.35 us)
      would dominate a microsecond-scale kernel otherwise.
    * large B: ~4096-row tiles (multiple of 8), with an EVEN number of grid
      steps so the "parallel" axis balances across v7x's two TensorCores.
    """
    SINGLE_TILE_MAX = 1024
    TARGET_TILE = 4096
    if B <= SINGLE_TILE_MAX:
        return B
    n_tiles = _cdiv(B, TARGET_TILE)
    if n_tiles % 2:
        n_tiles += 1              # even grid -> no idle TC on a remainder tile
    return max(8, _round_up(_cdiv(B, n_tiles), 8))


def prepare_decoder_params(params):
    """One-time parameter prep (call at init, NOT per forward):

    cast weights to bf16 and zero-pad hidden dims up to 128 lanes.
    """
    w1 = params["w1"].astype(jnp.bfloat16)
    w2 = params["w2"].astype(jnp.bfloat16)
    w3 = params["w3"].astype(jnp.bfloat16)
    b1 = params["b1"].astype(jnp.float32)
    b2 = params["b2"].astype(jnp.float32)
    b3 = params["b3"].astype(jnp.float32)

    h1, h2 = w1.shape[1], w2.shape[1]
    h1p, h2p = _round_up(h1, 128), _round_up(h2, 128)

    w1 = jnp.pad(w1, ((0, 0), (0, h1p - h1)))
    b1 = jnp.pad(b1, ((0, 0), (0, h1p - h1)))
    w2 = jnp.pad(w2, ((0, h1p - h1), (0, h2p - h2)))
    b2 = jnp.pad(b2, ((0, 0), (0, h2p - h2)))
    w3 = jnp.pad(w3, ((0, h2p - h2), (0, 0)))
    return (w1, b1, w2, b2, w3, b3)


# ----------------------------------------------------------------------------
# Forward pass
# ----------------------------------------------------------------------------
def decoder_forward(x, prepared_params, *, block_b=None,
                    out_dtype=jnp.float32):
    """x: (B, z_dim) f32.  prepared_params: output of prepare_decoder_params.

    out_dtype=jnp.bfloat16 nearly halves HBM traffic (the f32 output store is
    ~96% of per-row bytes) if the consumer accepts bf16; default keeps f32.
    """
    B, z_dim = x.shape
    w1, b1, w2, b2, w3, b3 = prepared_params
    h1p = w1.shape[1]
    h2p = w2.shape[1]
    out_dim = w3.shape[1]

    if block_b is None:
        block_b = _pick_block_b(B)
    grid = (_cdiv(B, block_b),)

    # Batch is tiled over the grid ("parallel" -> shardable over v7x's 2 TCs);
    # weights/biases use constant index maps so they stay VMEM resident.
    in_specs = [
        pl.BlockSpec((block_b, z_dim), lambda i: (i, 0)),        # x (f32)
        pl.BlockSpec((z_dim, h1p), lambda i: (0, 0)),            # w1
        pl.BlockSpec((1, h1p), lambda i: (0, 0)),                # b1
        pl.BlockSpec((h1p, h2p), lambda i: (0, 0)),              # w2
        pl.BlockSpec((1, h2p), lambda i: (0, 0)),                # b2
        pl.BlockSpec((h2p, out_dim), lambda i: (0, 0)),          # w3
        pl.BlockSpec((1, out_dim), lambda i: (0, 0)),            # b3
    ]
    out_spec = pl.BlockSpec((block_b, out_dim), lambda i: (i, 0))

    out_bytes = 2 if out_dtype == jnp.bfloat16 else 4
    flops = 2 * B * (z_dim * h1p + h1p * h2p + h2p * out_dim)
    bytes_accessed = (
        x.size * 4
        + (w1.size + w2.size + w3.size) * 2
        + (b1.size + b2.size + b3.size) * 4
        + B * out_dim * out_bytes
    )
    cost = pl.CostEstimate(flops=flops,
                           transcendentals=B * out_dim,
                           bytes_accessed=bytes_accessed)

    return pl.pallas_call(
        decoder_kernel,
        out_shape=jax.ShapeDtypeStruct((B, out_dim), out_dtype),
        grid_spec=pl.GridSpec(
            grid=grid,
            in_specs=in_specs,
            out_specs=out_spec,
        ),
        compiler_params=pltpu.CompilerParams(
            dimension_semantics=("parallel",)),
        cost_estimate=cost,
    )(x, w1, b1, w2, b2, w3, b3)


# ----------------------------------------------------------------------------
# Params / reference
# ----------------------------------------------------------------------------
def init_decoder_params(key, z_dim, h1_dim, h2_dim, output_dim):
    """PyTorch nn.Linear default init: U(-1/sqrt(fan_in), 1/sqrt(fan_in)).
    Weights stored transposed: (in_features, out_features), f32."""
    def linear(k, fan_in, fan_out):
        kw, kb = jax.random.split(k)
        bound = 1.0 / jnp.sqrt(jnp.float32(fan_in))
        w = jax.random.uniform(kw, (fan_in, fan_out), jnp.float32,
                               minval=-bound, maxval=bound)
        b = jax.random.uniform(kb, (1, fan_out), jnp.float32,
                               minval=-bound, maxval=bound)
        return w, b

    k1, k2, k3 = jax.random.split(key, 3)
    w1, b1 = linear(k1, z_dim, h1_dim)
    w2, b2 = linear(k2, h1_dim, h2_dim)
    w3, b3 = linear(k3, h2_dim, output_dim)
    return {"w1": w1, "b1": b1, "w2": w2, "b2": b2, "w3": w3, "b3": b3}


def decoder_reference(x, p):
    """Pure-JAX f32 reference for correctness check."""
    h1 = jax.nn.relu(x @ p["w1"] + p["b1"])
    h2 = jax.nn.relu(h1 @ p["w2"] + p["b2"])
    return jax.nn.sigmoid(h2 @ p["w3"] + p["b3"])


if __name__ == "__main__":
    z_dim, h1_dim, h2_dim, output_dim = 10, 32, 64, 128

    key = jax.random.PRNGKey(0)
    kx, kp, kx2 = jax.random.split(key, 3)

    params = init_decoder_params(kp, z_dim, h1_dim, h2_dim, output_dim)
    prepared = prepare_decoder_params(params)       # one-time prep, cached

    # --- small-batch case (single tile, grid=(1,)) ---
    batch = 8
    x = jax.random.normal(kx, (batch, z_dim), jnp.float32)
    out = jax.block_until_ready(decoder_forward(x, prepared))
    ref = decoder_reference(x, params)
    assert out.shape == (batch, output_dim), out.shape
    # bf16 matmul operands (f32 accumulation): loosen tolerance vs f32 ref.
    assert jnp.allclose(out, ref, atol=2e-2, rtol=2e-2), \
        float(jnp.max(jnp.abs(out - ref)))

    # --- ragged-last-tile case (masked output store check) ---
    batch2 = 200
    x2 = jax.random.normal(kx2, (batch2, z_dim), jnp.float32)
    out2 = jax.block_until_ready(decoder_forward(x2, prepared, block_b=64))
    ref2 = decoder_reference(x2, params)
    assert out2.shape == (batch2, output_dim), out2.shape
    assert jnp.allclose(out2, ref2, atol=2e-2, rtol=2e-2), \
        float(jnp.max(jnp.abs(out2 - ref2)))

    print("KERNEL_OK")
</pallas_src>

<mosaic_0001>
module attributes {stable_mosaic.version = 11 : i64} {
  func.func @decoder_kernel(%arg0: i32, %arg1: memref<8x10xf32, #tpu.memory_space<vmem>>, %arg2: memref<10x128xbf16, #tpu.memory_space<vmem>>, %arg3: memref<1x128xf32, #tpu.memory_space<vmem>>, %arg4: memref<128x128xbf16, #tpu.memory_space<vmem>>, %arg5: memref<1x128xf32, #tpu.memory_space<vmem>>, %arg6: memref<128x128xbf16, #tpu.memory_space<vmem>>, %arg7: memref<1x128xf32, #tpu.memory_space<vmem>>, %arg8: memref<8x128xf32, #tpu.memory_space<vmem>>) attributes {dimension_semantics = [#tpu.dimension_semantics<parallel>], iteration_bounds = array<i64: 1>, scalar_prefetch = 0 : i64, scratch_operands = 0 : i64, tpu.core_type = #tpu.core_type<tc>, window_params = [{transform_indices = @transform_0, window_bounds = array<i64: 8, 10>}, {pipeline_mode = #tpu.pipeline_mode<synchronous>, transform_indices = @transform_1, window_bounds = array<i64: 10, 128>}, {pipeline_mode = #tpu.pipeline_mode<synchronous>, transform_indices = @transform_2, window_bounds = array<i64: 1, 128>}, {pipeline_mode = #tpu.pipeline_mode<synchronous>, transform_indices = @transform_3, window_bounds = array<i64: 128, 128>}, {pipeline_mode = #tpu.pipeline_mode<synchronous>, transform_indices = @transform_4, window_bounds = array<i64: 1, 128>}, {pipeline_mode = #tpu.pipeline_mode<synchronous>, transform_indices = @transform_5, window_bounds = array<i64: 128, 128>}, {pipeline_mode = #tpu.pipeline_mode<synchronous>, transform_indices = @transform_6, window_bounds = array<i64: 1, 128>}, {transform_indices = @transform_7, window_bounds = array<i64: 8, 128>}]} {
    %c0 = arith.constant 0 : index
    %c0_0 = arith.constant 0 : index
    %0 = vector.load %arg1[%c0, %c0_0] : memref<8x10xf32, #tpu.memory_space<vmem>>, vector<8x10xf32>
    %1 = arith.truncf %0 : vector<8x10xf32> to vector<8x10xbf16>
    %c0_1 = arith.constant 0 : index
    %c0_2 = arith.constant 0 : index
    %2 = vector.load %arg2[%c0_1, %c0_2] : memref<10x128xbf16, #tpu.memory_space<vmem>>, vector<10x128xbf16>
    %cst = arith.constant dense<0.000000e+00> : vector<8x128xf32>
    %3 = tpu.matmul %1, %2, %cst {dimension_numbers = #tpu.dot_dimension_numbers<[1], [0], [0], [1], [0, 0, 1, 1], [], []>} : vector<8x10xbf16>, vector<10x128xbf16>, vector<8x128xf32> -> vector<8x128xf32>
    %c0_3 = arith.constant 0 : index
    %c0_4 = arith.constant 0 : index
    %4 = vector.load %arg3[%c0_3, %c0_4] : memref<1x128xf32, #tpu.memory_space<vmem>>, vector<1x128xf32>
    %5 = vector.broadcast %4 : vector<1x128xf32> to vector<8x128xf32>
    %6 = arith.addf %3, %5 : vector<8x128xf32>
    %cst_5 = arith.constant 0.000000e+00 : f32
    %7 = vector.broadcast %cst_5 : f32 to vector<8x128xf32>
    %8 = arith.maximumf %6, %7 : vector<8x128xf32>
    %9 = arith.truncf %8 : vector<8x128xf32> to vector<8x128xbf16>
    %c0_6 = arith.constant 0 : index
    %c0_7 = arith.constant 0 : index
    %10 = vector.load %arg4[%c0_6, %c0_7] : memref<128x128xbf16, #tpu.memory_space<vmem>>, vector<128x128xbf16>
    %cst_8 = arith.constant dense<0.000000e+00> : vector<8x128xf32>
    %11 = tpu.matmul %9, %10, %cst_8 {dimension_numbers = #tpu.dot_dimension_numbers<[1], [0], [0], [1], [0, 0, 1, 1], [], []>} : vector<8x128xbf16>, vector<128x128xbf16>, vector<8x128xf32> -> vector<8x128xf32>
    %c0_9 = arith.constant 0 : index
    %c0_10 = arith.constant 0 : index
    %12 = vector.load %arg5[%c0_9, %c0_10] : memref<1x128xf32, #tpu.memory_space<vmem>>, vector<1x128xf32>
    %13 = vector.broadcast %12 : vector<1x128xf32> to vector<8x128xf32>
    %14 = arith.addf %11, %13 : vector<8x128xf32>
    %cst_11 = arith.constant 0.000000e+00 : f32
    %15 = vector.broadcast %cst_11 : f32 to vector<8x128xf32>
    %16 = arith.maximumf %14, %15 : vector<8x128xf32>
    %17 = arith.truncf %16 : vector<8x128xf32> to vector<8x128xbf16>
    %c0_12 = arith.constant 0 : index
    %c0_13 = arith.constant 0 : index
    %18 = vector.load %arg6[%c0_12, %c0_13] : memref<128x128xbf16, #tpu.memory_space<vmem>>, vector<128x128xbf16>
    %cst_14 = arith.constant dense<0.000000e+00> : vector<8x128xf32>
    %19 = tpu.matmul %17, %18, %cst_14 {dimension_numbers = #tpu.dot_dimension_numbers<[1], [0], [0], [1], [0, 0, 1, 1], [], []>} : vector<8x128xbf16>, vector<128x128xbf16>, vector<8x128xf32> -> vector<8x128xf32>
    %c0_15 = arith.constant 0 : index
    %c0_16 = arith.constant 0 : index
    %20 = vector.load %arg7[%c0_15, %c0_16] : memref<1x128xf32, #tpu.memory_space<vmem>>, vector<1x128xf32>
    %21 = vector.broadcast %20 : vector<1x128xf32> to vector<8x128xf32>
    %22 = arith.addf %19, %21 : vector<8x128xf32>
    %23 = arith.negf %22 : vector<8x128xf32>
    %24 = math.exp %23 : vector<8x128xf32>
    %cst_17 = arith.constant 1.000000e+00 : f32
    %25 = vector.broadcast %cst_17 : f32 to vector<8x128xf32>
    %26 = arith.addf %25, %24 : vector<8x128xf32>
    %27 = arith.divf %25, %26 : vector<8x128xf32>
    %c0_18 = arith.constant 0 : index
    %c0_19 = arith.constant 0 : index
    %28 = vector.load %arg8[%c0_18, %c0_19] : memref<8x128xf32, #tpu.memory_space<vmem>>, vector<8x128xf32>
    tpu.vector_store %arg8[%c0_18, %c0_19], %27 {strides = array<i32>} : memref<8x128xf32, #tpu.memory_space<vmem>>, vector<8x128xf32>,
    return
  }
  func.func @transform_0(%arg0: i32) -> (i32, i32) {
    %c0_i32 = arith.constant 0 : i32
    %c0_i32_0 = arith.constant 0 : i32
    return %arg0, %c0_i32 : i32, i32
  }
  func.func @transform_1(%arg0: i32) -> (i32, i32) {
    %c0_i32 = arith.constant 0 : i32
    %c0_i32_0 = arith.constant 0 : i32
    %c0_i32_1 = arith.constant 0 : i32
    return %c0_i32, %c0_i32_0 : i32, i32
  }
  func.func @transform_2(%arg0: i32) -> (i32, i32) {
    %c0_i32 = arith.constant 0 : i32
    %c0_i32_0 = arith.constant 0 : i32
    %c0_i32_1 = arith.constant 0 : i32
    return %c0_i32, %c0_i32_0 : i32, i32
  }
  func.func @transform_3(%arg0: i32) -> (i32, i32) {
    %c0_i32 = arith.constant 0 : i32
    %c0_i32_0 = arith.constant 0 : i32
    %c0_i32_1 = arith.constant 0 : i32
    return %c0_i32, %c0_i32_0 : i32, i32
  }
  func.func @transform_4(%arg0: i32) -> (i32, i32) {
    %c0_i32 = arith.constant 0 : i32
    %c0_i32_0 = arith.constant 0 : i32
    %c0_i32_1 = arith.constant 0 : i32
    return %c0_i32, %c0_i32_0 : i32, i32
  }
  func.func @transform_5(%arg0: i32) -> (i32, i32) {
    %c0_i32 = arith.constant 0 : i32
    %c0_i32_0 = arith.constant 0 : i32
    %c0_i32_1 = arith.constant 0 : i32
    return %c0_i32, %c0_i32_0 : i32, i32
  }
  func.func @transform_6(%arg0: i32) -> (i32, i32) {
    %c0_i32 = arith.constant 0 : i32
    %c0_i32_0 = arith.constant 0 : i32
    %c0_i32_1 = arith.constant 0 : i32
    return %c0_i32, %c0_i32_0 : i32, i32
  }
  func.func @transform_7(%arg0: i32) -> (i32, i32) {
    %c0_i32 = arith.constant 0 : i32
    %c0_i32_0 = arith.constant 0 : i32
    return %arg0, %c0_i32 : i32, i32
  }
}

</mosaic_0001>

<bundles_post_ra>
// kernel: tpu_custom_call.1
= control target key start
LH: loop header
LB: loop body
LE: loop exit
PB: predicated region body
PF: predicated region fallthrough
CT: control target
= control target key end

     0   :  { %12 = vsyncpa [#allocation3], 0  ;;  %s726_s0 = inlined_call_operand.hbm [shape: f32[8,10], index: 0, kind: input, shape index: {}]   ;;  %s727_s1 = inlined_call_operand.hbm [shape: bf16[10,128], index: 1, kind: input, shape index: {}]   ;;  %s728_s2 = inlined_call_operand.vmem [shape: f32[1,128], index: 2, kind: input, shape index: {}]   ;;  %s729_s3 = inlined_call_operand.hbm [shape: bf16[128,128], index: 3, kind: input, shape index: {}]   ;;  %s730_s4 = inlined_call_operand.vmem [shape: f32[1,128], index: 4, kind: input, shape index: {}]   ;;  %s731_s5 = inlined_call_operand.hbm [shape: bf16[128,128], index: 5, kind: input, shape index: {}]   ;;  %s732_s6 = inlined_call_operand.vmem [shape: f32[1,128], index: 6, kind: input, shape index: {}]   ;;  %s733_s7 = inlined_call_operand.hbm [shape: f32[8,128], index: 7, kind: output, shape index: {}]  }
   0x1   :  { %13 = vsyncpa [#allocation6], 0 }
   0x2   :  { %14 = vsyncpa [#allocation9], 0 }
   0x3   :  { %15 = vsyncpa [#allocation4], 0  ;;  %s621_s24 = smov [#allocation5]  }
   0x4   :  { %s31_s25 = sshll.u32 %s621_s24, 4  ;;  %s32_s25 = int_to_ptr.vmem [resolvable:$true] %s31_s25 }
   0x5   :  { %s521_s26 = scalar_lea.vmem %s32_s25, 128  ;;  %p526_p1 = scmp.lt.s32.totalorder %s32_s25, %s32_s25 }
   0x6   :  { %p522_p0 = scmp.ne.s32.totalorder %s32_s25, %s521_s26  ;;  %p527_p2 = scmp.lt.s32.totalorder %s521_s26, %s521_s26 }
   0x8   :  { %p528_p3 = por %p527_p2, %p526_p1 }
   0xa   :  { %p529_p4 = pnand %p528_p3, %p522_p0 }
   0xc   :  { %532 = shalt.err (!%p529_p4)
}
   0xd   :  { %s622_s27 = smov 64   ;;  %s623_s28 = smov 4  }
   0xe   :  { %37 = dma.hbm_to_vmem [thread:$0]  %s727_s1, 128, %s32_s25, [#allocation6], %s622_s27, %s622_s27, %s623_s28  }
   0xf   :  { %s624_s8 = smov [#allocation2]   ;;  %s625_s10 = smov [#allocation7]  }
  0x10   :  { %s22_s9 = sshll.u32 %s624_s8, 4  ;;  %s45_s11 = sshll.u32 %s625_s10, 4  ;;  %s23_s9 = int_to_ptr.vmem [resolvable:$true] %s22_s9  ;;  %s46_s11 = int_to_ptr.vmem [resolvable:$true] %s45_s11 }
  0x11   :  { %s541_s12 = scalar_lea.vmem %s23_s9, 128  ;;  %p546_p6 = scmp.lt.s32.totalorder %s23_s9, %s23_s9 }
  0x12   :  { %p542_p5 = scmp.ne.s32.totalorder %s23_s9, %s541_s12  ;;  %p547_p7 = scmp.lt.s32.totalorder %s541_s12, %s541_s12 }
  0x14   :  { %p548_p8 = por %p547_p7, %p546_p6 }
  0x16   :  { %p549_p9 = pnand %p548_p8, %p542_p5 }
  0x18   :  { %552 = shalt.err (!%p549_p9)
}
  0x19   :  { %25 = dma.hbm_to_vmem [thread:$0]  %s726_s0, 128, %s23_s9, [#allocation3]  }
  0x1a   :  { %s561_s15 = scalar_lea.vmem %s46_s11, 1024  ;;  %p566_p11 = scmp.lt.s32.totalorder %s46_s11, %s46_s11 }
  0x1b   :  { %p562_p10 = scmp.ne.s32.totalorder %s46_s11, %s561_s15  ;;  %p567_p12 = scmp.lt.s32.totalorder %s561_s15, %s561_s15 }
  0x1d   :  { %p568_p13 = por %p567_p12, %p566_p11 }
  0x1f   :  { %p569_p0 = pnand %p568_p13, %p562_p10 }
  0x21   :  { %572 = shalt.err (!%p569_p0)
}
  0x22   :  { %51 = dma.hbm_to_vmem [thread:$0]  %s729_s3, 1024, %s46_s11, [#allocation6], %s622_s27, %s622_s27, %s623_s28  }
  0x23   :  { %s626_s17 = smov [#allocation8]  }
  0x24   :  { %s59_s18 = sshll.u32 %s626_s17, 4  ;;  %s60_s18 = int_to_ptr.vmem [resolvable:$true] %s59_s18 }
  0x25   :  { %s581_s19 = scalar_lea.vmem %s60_s18, 1024  ;;  %p586_p2 = scmp.lt.s32.totalorder %s60_s18, %s60_s18 }
  0x26   :  { %p582_p1 = scmp.ne.s32.totalorder %s60_s18, %s581_s19  ;;  %p587_p3 = scmp.lt.s32.totalorder %s581_s19, %s581_s19 }
  0x28   :  { %p588_p4 = por %p587_p3, %p586_p2 }
  0x2a   :  { %p589_p5 = pnand %p588_p4, %p582_p1 }
  0x2c   :  { %592 = shalt.err (!%p589_p5)
}
  0x2d   :  { %65 = dma.hbm_to_vmem [thread:$0]  %s731_s5, 1024, %s60_s18, [#allocation9], %s622_s27, %s622_s27, %s623_s28  }
  0x2e   :  { %613 = dma.done.wait [#allocation3], 128  }
  0x2f   :  { %614 = vsyncadd [#allocation3], 4294967168 }
  0x30   :  { %615 = dma.done.wait [#allocation6], 1152  }
  0x31   :  { %616 = vsyncadd [#allocation6], 4294966144 }
  0x32   :  { %617 = dma.done.wait [#allocation9], 1024  }
  0x33   :  { %618 = vsyncadd [#allocation9], 4294966272  ;;  %v627_v0 = vmov 0.0   ;;  %vm628_vm0 = vmmov 0   ;;  %vm101_vm1 = vcmask 1044480   ;;  %v81_v2 = vld [vmem:[#allocation2] sm:$0xff] }
  0x34   :  { %437 = vmatprep.subr.bf16.mxu0 %v627_v0  ;;  %439 = vmatprep.mubr.msk.bf16.mxu0 %vm628_vm0, %v627_v0  ;;  %v492_v1 = vld [vmem:[#allocation5] sm:$0x1f]   ;;  %v82_v4 = vpack.c.bf16 %v81_v2, %v81_v2  ;;  %vm97_vm2 = vcmask 80896   ;;  %v494_v6 = vld [vmem:[#allocation7 + $0x30] sm:$0xff]   ;;  %v495_v7 = vld [vmem:[#allocation7 + $0x28] sm:$0xff]  }
  0x35   :  { %443 = vmatprep.subr.bf16.mxu1 %v627_v0  ;;  %459 = vmatprep.mubr.msk.bf16.mxu1 %vm628_vm0, %v627_v0  ;;  %v103_v3 = vsel %vm101_vm1, %v492_v1, 0  ;;  %v493_v5 = vld [vmem:[#allocation7 + $0x38] sm:$0xff]   ;;  %v496_v8 = vld [vmem:[#allocation7 + $0x20] sm:$0xff]   ;;  %v498_v10 = vld [vmem:[#allocation7 + $0x10] sm:$0xff]  }
  0x36   :  { %438 = vmatpush3.bf16.msra.mxu0 %v103_v3  ;;  %444 = vmatpush3.bf16.msra.mxu1 %v493_v5  ;;  %v497_v9 = vld [vmem:[#allocation7 + $0x18] sm:$0xff]   ;;  %v499_v11 = vld [vmem:[#allocation7 + $0x8] sm:$0xff]   ;;  %v500_v12 = vld [vmem:[#allocation7] sm:$0xff]  }
  0x37   :  { %463 = vmatprep.subr.bf16.mxu0 %v627_v0  ;;  %445 = vmatprep.subr.bf16.mxu1 %v627_v0  ;;  %v501_v13 = vld [vmem:[#allocation8 + $0x38] sm:$0xff]   ;;  %v502_v14 = vld [vmem:[#allocation8 + $0x30] sm:$0xff]   ;;  %v503_v15 = vld [vmem:[#allocation8 + $0x28] sm:$0xff]  }
  0x38   :  { %v504_v16 = vld [vmem:[#allocation8 + $0x20] sm:$0xff]   ;;  %v505_v17 = vld [vmem:[#allocation8 + $0x18] sm:$0xff]   ;;  %v506_v18 = vld [vmem:[#allocation8 + $0x10] sm:$0xff]  }
  0x39   :  { %440 = vmatmul.mubr.msk.bf16.vlgmr.msra.gmra.mxu0 %vm97_vm2, %v82_v4  ;;  %v395_v19 = vld [vmem:[%s728_s2] ss:$0 sm:$0xff]  ;;  %v507_v27 = vld [vmem:[#allocation8 + $0x8] sm:$0xff]   ;;  %v508_v28 = vld [vmem:[#allocation8] sm:$0xff]  }
  0x3a   :  { %479 = vmatprep.mubr.msk.bf16.mxu0 %vm628_vm0, %v627_v0  ;;  %446 = vmatpush3.bf16.msra.mxu1 %v494_v6  ;;  %v398_v29 = vld [vmem:[%s730_s4] ss:$0 sm:$0xff]  ;;  %s629_s4 = smov [#allocation10]  }
  0x3b   :  { %447 = vmatprep.subr.bf16.mxu1 %v627_v0  ;;  %464 = vmatpush3.bf16.msra.mxu0 %v501_v13  ;;  %v407_v37 = vld [vmem:[%s732_s6] ss:$0 sm:$0xff]  ;;  %s384_s24 = sshll.u32 %s629_s4, 4  ;;  %s385_s24 = int_to_ptr.vmem [resolvable:$true] %s384_s24 }
  0x3c   :  { %465 = vmatprep.subr.bf16.mxu0 %v627_v0  ;;  %s593_s25 = scalar_lea.vmem %s385_s24, 128  ;;  %p598_p7 = scmp.lt.s32.totalorder %s385_s24, %s385_s24 }
  0x3d   :  { %p594_p6 = scmp.ne.s32.totalorder %s385_s24, %s593_s25  ;;  %p599_p8 = scmp.lt.s32.totalorder %s593_s25, %s593_s25 }
  0x3e   :  { %448 = vmatpush3.bf16.msra.mxu1 %v495_v7 }
  0x3f   :  { %449 = vmatprep.subr.bf16.mxu1 %v627_v0  ;;  %466 = vmatpush3.bf16.msra.mxu0 %v502_v14  ;;  %p600_p9 = por %p599_p8, %p598_p7 }
  0x40   :  { %467 = vmatprep.subr.bf16.mxu0 %v627_v0 }
  0x41   :  { %p601_p10 = pnand %p600_p9, %p594_p6 }
  0x42   :  { %450 = vmatpush3.bf16.msra.mxu1 %v496_v8 }
  0x43   :  { %451 = vmatprep.subr.bf16.mxu1 %v627_v0  ;;  %468 = vmatpush3.bf16.msra.mxu0 %v503_v15 }
  0x44   :  { %469 = vmatprep.subr.bf16.mxu0 %v627_v0 }
  0x46   :  { %452 = vmatpush3.bf16.msra.mxu1 %v497_v9 }
  0x47   :  { %453 = vmatprep.subr.bf16.mxu1 %v627_v0  ;;  %470 = vmatpush3.bf16.msra.mxu0 %v504_v16 }
  0x48   :  { %471 = vmatprep.subr.bf16.mxu0 %v627_v0 }
  0x4a   :  { %454 = vmatpush3.bf16.msra.mxu1 %v498_v10 }
  0x4b   :  { %455 = vmatprep.subr.bf16.mxu1 %v627_v0  ;;  %472 = vmatpush3.bf16.msra.mxu0 %v505_v17 }
  0x4c   :  { %473 = vmatprep.subr.bf16.mxu0 %v627_v0 }
  0x4e   :  { %456 = vmatpush3.bf16.msra.mxu1 %v499_v11 }
  0x4f   :  { %457 = vmatprep.subr.bf16.mxu1 %v627_v0  ;;  %474 = vmatpush3.bf16.msra.mxu0 %v506_v18 }
  0x50   :  { %475 = vmatprep.subr.bf16.mxu0 %v627_v0 }
  0x52   :  { %458 = vmatpush3.bf16.msra.mxu1 %v500_v12 }
  0x53   :  { %476 = vmatpush3.bf16.msra.mxu0 %v507_v27 }
  0x54   :  { %477 = vmatprep.subr.bf16.mxu0 %v627_v0 }
  0x57   :  { %478 = vmatpush3.bf16.msra.mxu0 %v508_v28 }
  0xf9   :  { %v139_v20 = vpop.f32.mrf.mxu0 }
  0xfa   :  { %v140_v21 = vadd.f32 %v395_v19, %v139_v20 }
  0xfb   :  { %v441_v22 = vpop.f32.mrf.mxu0 }
  0xfc   :  { %v145_v23 = vmax.f32 %v140_v21, 0.0 }
  0xfd   :  { %v142_v24 = vpop.f32.mrf.mxu0 }
  0xfe   :  { %v146_v25 = vpack.c.bf16 %v145_v23, %v145_v23 }
  0xff   :  { %v442_v26 = vpop.f32.mrf.mxu0 }
 0x100   :  { %460 = vmatmul.mubr.bf16.vlgmr.msra.gmra.mxu1 %v146_v25 }
 0x1c0   :  { %v252_v30 = vpop.f32.mrf.mxu1 }
 0x1c1   :  { %v253_v31 = vadd.f32 %v398_v29, %v252_v30 }
 0x1c2   :  { %v461_v32 = vpop.f32.mrf.mxu1 }
 0x1c3   :  { %v258_v33 = vmax.f32 %v253_v31, 0.0 }
 0x1c4   :  { %v255_v34 = vpop.f32.mrf.mxu1 }
 0x1c5   :  { %v259_v35 = vpack.c.bf16 %v258_v33, %v258_v33 }
 0x1c6   :  { %v462_v36 = vpop.f32.mrf.mxu1 }
 0x1c7   :  { %480 = vmatmul.mubr.bf16.vlgmr.msra.gmra.mxu0 %v259_v35 }
 0x287   :  { %v365_v38 = vpop.f32.mrf.mxu0 }
 0x288   :  { %v366_v39 = vadd.f32 %v407_v37, %v365_v38 }
 0x289   :  { %v481_v40 = vpop.f32.mrf.mxu0 }
 0x28a   :  { %v416_v41 = vmul.f32 -1.442695, %v366_v39 }
 0x28b   :  { %v368_v42 = vpop.f32.mrf.mxu0 }
 0x28c   :  { %509 = vpow2.f32 %v416_v41 }
 0x28d   :  { %v482_v43 = vpop.f32.mrf.mxu0 }
 0x299   :  { %v510_v44 = vpop.eup %509 }
 0x29a   :  { %v374_v45 = vadd.f32 1.0, %v510_v44 }
 0x29c   :  { %511 = vrcp.f32 %v374_v45 }
 0x2a9   :  { %v512_v46 = vpop.eup %511 }
 0x2aa   :  { %377 = vst [vmem:[#allocation10] sm:$0xff] %v512_v46 }
 0x2ab   :  { %604 = shalt.err (!%p601_p10)
}
 0x2ac   :  { %387 = dma.vmem_to_hbm [thread:$0]  %s385_s24, 128, %s733_s7, [#allocation4]  }
 0x2ad   :  { %619 = dma.done.wait [#allocation4], 128  }
 0x2ae   :  { %620 = vsyncadd [#allocation4], 4294967168 }
 0x2af   :  { %391 = vsyncpa [#allocation3], 1 }
 0x2b0   :  { %392 = vsyncpa [#allocation6], 1 }
 0x2b1   :  { %393 = vsyncpa [#allocation9], 1 }
 0x2b2   :  { %394 = vsyncpa [#allocation4], 1 }

</bundles_post_ra>
